<compile_context>
chip_gen: v7x
topology: tpu7x:2x2x1
jax: 0.10.0
libtpu: 0.0.40
codegen_flags: <defaults>
</compile_context>

<pallas_src>
import functools

import jax
import jax.numpy as jnp
from jax.experimental import pallas as pl
from jax.experimental.pallas import tpu as pltpu

# Darknet defaults for the UpsampleLayer
UPSAMP_STRIDE_DEF = 2
UPSAMP_MODE_DEF = "nearest"

_VMEM_LIMIT_BYTES = 32 * 1024 * 1024   # explicit scoped-VMEM limit, safe on v5e/v6e/v7x
_TILE_BUDGET_CAP = 4 * 1024 * 1024     # ~2-4 MiB tiles already hit ~85% of HBM roofline


def _ceil_to(v, m):
    return ((v + m - 1) // m) * m


def _upsample_nearest_kernel(x_ref, o_ref, *, stride):
    # x_ref: (cb, hb, W) input tile.
    # o_ref: (cb, hb, stride*W*stride) output tile == (hb, stride, W, stride) flattened,
    #        i.e. the H-replica index is the MAJOR chunk of the lane axis.
    x = x_ref[...]
    cb, hb, w = x.shape
    ws = w * stride

    # W (lane) replication: interleave each input element `stride` times along lanes.
    xw = jnp.broadcast_to(x[:, :, :, None], (cb, hb, w, stride)).reshape(cb, hb, ws)

    if stride == 1:
        o_ref[...] = xw
    else:
        # H replication: each replica is a contiguous lane-chunk store of the same
        # W-replicated rows -- no sublane-interleave relayout of the output tile.
        for k in range(stride):
            o_ref[:, :, pl.ds(k * ws, ws)] = xw


def _select_tiles(NC, H, W, s, itemsize):
    """Pick (cb, hb) so each grid step moves a ~few-MiB tile and the grid has >=8 steps."""
    sub = max(8, 32 // itemsize)          # dtype sublane tile: f32 -> 8, bf16 -> 16, int8 -> 32
    lane = 128
    try:
        vmem_cap = pltpu.get_tpu_info().vmem_capacity_bytes
    except Exception:                     # pragma: no cover - interpret mode / older jax
        vmem_cap = 64 * 1024 * 1024
    budget = min(_TILE_BUDGET_CAP, max(1 * 1024 * 1024, vmem_cap // 16))

    wo_flat = s * W * s
    # VMEM-padded ((sub,128)-tiled) per-channel footprints.
    in_plane = _ceil_to(H, sub) * _ceil_to(W, lane) * itemsize
    out_plane = _ceil_to(H, sub) * _ceil_to(wo_flat, lane) * itemsize
    # Pipelined input/output buffers (2-3 deep) plus Mosaic lane-merge temps for xw.
    per_chan = 3 * in_plane + 4 * out_plane

    if per_chan <= budget:
        cb = max(1, budget // per_chan)
        cb = min(cb, NC)
        cb = min(cb, max(1, NC // 8))                     # keep >= ~8 pipelined grid steps
        steps = pl.cdiv(NC, cb)
        if steps > 1:                                     # even step count -> both v7x TCs busy
            cb = pl.cdiv(NC, 2 * pl.cdiv(NC, 2 * cb))
        hb = H
    else:
        # Huge spatial planes: block rows instead, aligned to the dtype sublane tile.
        cb = 1
        rows = max(sub, (H * budget // per_chan) // sub * sub)
        hb = min(H, rows)
    return cb, hb


def upsample_layer(x, stride=UPSAMP_STRIDE_DEF, mode=UPSAMP_MODE_DEF):
    """Forward pass of UpsampleLayer: nn.Upsample(scale_factor=stride, mode=mode), NCHW."""
    if mode != "nearest":
        # TODO(synk): only 'nearest' (the darknet default) is implemented in the kernel.
        raise NotImplementedError(f"mode={mode!r} not supported")
    if float(stride) != int(stride):
        # TODO(synk): fractional nearest upsample would need index-mapped gather rows.
        raise NotImplementedError(f"non-integer scale_factor {stride!r} not supported")
    s = int(stride)
    if s < 1:
        raise ValueError(f"stride must be >= 1, got {stride}")

    N, C, H, W = x.shape
    Ho, Wo = H * s, W * s
    NC = N * C
    wo_flat = s * W * s
    itemsize = jnp.dtype(x.dtype).itemsize

    cb, hb = _select_tiles(NC, H, W, s, itemsize)
    grid = (pl.cdiv(NC, cb), pl.cdiv(H, hb))

    xf = x.reshape(NC, H, W)  # free (contiguous) reshape

    kernel = functools.partial(_upsample_nearest_kernel, stride=s)
    cost = pl.CostEstimate(
        flops=0,
        transcendentals=0,
        bytes_accessed=(NC * H * W + NC * H * wo_flat) * itemsize,
    )

    def _call(use_buffered_out):
        if use_buffered_out and grid[0] * grid[1] >= 4:
            # Deeper buffering on the dominant (write) stream.
            out_spec = pl.BlockSpec((cb, hb, wo_flat), lambda ci, hi: (ci, hi, 0),
                                    pipeline_mode=pl.Buffered(3))
        else:
            out_spec = pl.BlockSpec((cb, hb, wo_flat), lambda ci, hi: (ci, hi, 0))
        return pl.pallas_call(
            kernel,
            out_shape=jax.ShapeDtypeStruct((NC, H, wo_flat), x.dtype),
            grid_spec=pltpu.PrefetchScalarGridSpec(
                num_scalar_prefetch=0,
                grid=grid,
                in_specs=[pl.BlockSpec((cb, hb, W), lambda ci, hi: (ci, hi, 0))],
                out_specs=out_spec,
            ),
            compiler_params=pltpu.CompilerParams(
                dimension_semantics=("parallel", "parallel"),
                vmem_limit_bytes=_VMEM_LIMIT_BYTES,
            ),
            cost_estimate=cost,
        )(xf)

    try:
        out_flat = _call(True)
    except Exception:
        # Fall back without pipeline_mode if this Pallas version rejects pl.Buffered.
        out_flat = _call(False)

    # (NC, H, s*W*s) is the row-major-contiguous view of (N, C, H*s, W*s): free reshape.
    return out_flat.reshape(N, C, Ho, Wo)


if __name__ == "__main__":
    key = jax.random.PRNGKey(0)
    # Small NCHW shapes matching the PyTorch module: batch=2, channels=4, spatial=16x16.
    x = jax.random.normal(key, (2, 4, 16, 16), dtype=jnp.float32)

    out = jax.block_until_ready(
        upsample_layer(x, stride=UPSAMP_STRIDE_DEF, mode=UPSAMP_MODE_DEF)
    )

    # Reference: nearest upsample == repeat along H and W.
    ref = jnp.repeat(jnp.repeat(x, UPSAMP_STRIDE_DEF, axis=2), UPSAMP_STRIDE_DEF, axis=3)

    assert out.shape == (2, 4, 32, 32), out.shape
    assert out.dtype == x.dtype
    assert bool(jnp.array_equal(out, ref)), "mismatch vs reference nearest upsample"

    print("KERNEL_OK")
</pallas_src>

<mosaic_0001>
module attributes {stable_mosaic.version = 11 : i64} {
  func.func @_upsample_nearest_kernel(%arg0: i32, %arg1: i32, %arg2: memref<1x16x16xf32, #tpu.memory_space<vmem>>, %arg3: memref<1x16x64xf32, #tpu.memory_space<vmem>>) attributes {dimension_semantics = [#tpu.dimension_semantics<parallel>, #tpu.dimension_semantics<parallel>], iteration_bounds = array<i64: 8, 1>, scalar_prefetch = 0 : i64, scratch_operands = 0 : i64, tpu.core_type = #tpu.core_type<tc>, window_params = [{transform_indices = @transform_0, window_bounds = array<i64: 1, 16, 16>}, {transform_indices = @transform_1, window_bounds = array<i64: 1, 16, 64>}]} {
    %c0 = arith.constant 0 : index
    %c0_0 = arith.constant 0 : index
    %c0_1 = arith.constant 0 : index
    %0 = vector.load %arg2[%c0, %c0_0, %c0_1] : memref<1x16x16xf32, #tpu.memory_space<vmem>>, vector<1x16x16xf32>
    %1 = vector.shape_cast %0 : vector<1x16x16xf32> to vector<1x16x16x1xf32>
    %2 = vector.shape_cast %1 : vector<1x16x16x1xf32> to vector<1x16x16x1xf32>
    %3 = vector.broadcast %2 : vector<1x16x16x1xf32> to vector<1x16x16x2xf32>
    %4 = vector.shape_cast %3 : vector<1x16x16x2xf32> to vector<1x16x32xf32>
    %c0_2 = arith.constant 0 : index
    %c0_3 = arith.constant 0 : index
    %c0_4 = arith.constant 0 : index
    %5 = vector.load %arg3[%c0_2, %c0_3, %c0_4] : memref<1x16x64xf32, #tpu.memory_space<vmem>>, vector<1x16x32xf32>
    tpu.vector_store %arg3[%c0_2, %c0_3, %c0_4], %4 {strides = array<i32>} : memref<1x16x64xf32, #tpu.memory_space<vmem>>, vector<1x16x32xf32>,
    %c0_5 = arith.constant 0 : index
    %c0_6 = arith.constant 0 : index
    %c32 = arith.constant 32 : index
    %6 = vector.load %arg3[%c0_5, %c0_6, %c32] : memref<1x16x64xf32, #tpu.memory_space<vmem>>, vector<1x16x32xf32>
    tpu.vector_store %arg3[%c0_5, %c0_6, %c32], %4 {strides = array<i32>} : memref<1x16x64xf32, #tpu.memory_space<vmem>>, vector<1x16x32xf32>,
    return
  }
  func.func @transform_0(%arg0: i32, %arg1: i32) -> (i32, i32, i32) {
    %c0_i32 = arith.constant 0 : i32
    %c0_i32_0 = arith.constant 0 : i32
    return %arg0, %arg1, %c0_i32 : i32, i32, i32
  }
  func.func @transform_1(%arg0: i32, %arg1: i32) -> (i32, i32, i32) {
    %c0_i32 = arith.constant 0 : i32
    %c0_i32_0 = arith.constant 0 : i32
    return %arg0, %arg1, %c0_i32 : i32, i32, i32
  }
}

</mosaic_0001>

<bundles_post_ra>
// kernel: tpu_custom_call.1
= control target key start
LH: loop header
LB: loop body
LE: loop exit
PB: predicated region body
PF: predicated region fallthrough
CT: control target
= control target key end

     0   :  { %6 = vsyncpa [#allocation3], 0  ;;  %s1796_s0 = inlined_call_operand.hbm [shape: f32[8,16,16], index: 0, kind: input, shape index: {}]   ;;  %s1797_s1 = inlined_call_operand.hbm [shape: f32[8,16,64], index: 1, kind: output, shape index: {}]  }
   0x1   :  { %8 = vsyncpa [#allocation3 + $0x1], 0 }
   0x2   :  { %9 = vsyncpa [#allocation4], 0 }
   0x3   :  { %11 = vsyncpa [#allocation4 + $0x1], 0  ;;  %s1406_s6 = smov 0   ;;  %s1408_s7 = smov 0  }
   0x4   :  { %s1410_s8 = smov 0   ;;  %s1412_s9 = smov 0  }
   0x5   :  { %s1414_s10 = smov 0   ;;  %s1416_s11 = smov 0  }
   0x6 LB: > { %s1159_s12 = sadd.s32 4294967295, %s1371_s11   ;;  %s1160_s13 = sadd.s32 4294967294, %s1371_s11   ;;  %s1371_s11 = sphi %s1416_s11, %s17_s11   ;;  %s1367_s10 = sphi %s1414_s10, %s1811_s10   ;;  %s1363_s9 = sphi %s1412_s9, %s1810_s9   ;;  %s1359_s8 = sphi %s1410_s8, %s1809_s8   ;;  %s1355_s7 = sphi %s1408_s7, %s1808_s7   ;;  %s1351_s6 = sphi %s1406_s6, %s1807_s6  }
   0x7   : > { %s29_s14 = sadd.s32 1, %s1367_s10  ;;  %s38_s15 = sadd.s32 1, %s1359_s8 }
   0x8   : > { %p31_p0 = scmp.ge.s32.totalorder %s29_s14, 8  ;;  %p45_p1 = scmp.ne.s32.totalorder %s1359_s8, %s1355_s7 }
   0x9   : > { %p46_p2 = scmp.eq.s32.totalorder %s1371_s11, 0  ;;  %p51_p3 = scmp.ne.s32.totalorder %s1355_s7, %s1351_s6 }
   0xa   : > { %s1813_s14 = smov (%p31_p0, %s29_s14), 0  ;;  %p52_p5 = scmp.eq.s32.totalorder %s1159_s12, 0 }
   0xb   : > { %p1447_p4 = por %p46_p2, %p45_p1  ;;  %s33_s17 = ssub.s32 %s1367_s10, %s1813_s14 }
   0xc   : > { %p77_p6 = scmp.eq.s32.totalorder %s1159_s12, 7  ;;  %p36_p7 = scmp.eq.s32.totalorder %s33_s17, 0 }
   0xd   : > { %p1453_p8 = por %p52_p5, %p51_p3  ;;  %p83_p10 = scmp.eq.s32.totalorder %s1160_s13, 7 }
   0xe   : > { %p1457_p9 = por %p77_p6, %p45_p1  ;;  %p1188_p12 = scmp.lt.s32.totalorder %s1371_s11, 8 }
   0xf   : > { %s1462_s20 = scalar_select %p36_p7, %s1359_s8, %s38_s15  }
  0x10   : > { %s1801_s19 = scalar_select %p1457_p9, 1, 0 }
  0x11   : > { %p1464_p11 = por %p83_p10, %p51_p3  ;;  %s103_s22 = sand.u32 1, %s1359_s8  }
  0x12   : > { %s1163_s23 = sshll.u32 %s103_s22, 4  ;;  %s1174_s24 = sshll.u32 %s1367_s10, 8 }
  0x13   : > { %s1802_s21 = scalar_select %p1464_p11, 1, 0 }
  0x14   : > { %s1474_s27 = scalar_lea.hbm %s1796_s0, %s1174_s24  ;;  %s107_s28 = scalar_lea.vmem [#allocation2], %s1163_s23 }
  0x15   : > { %s116_s29 = sshll.u32 %s107_s28, 4  ;;  %p1480_p13 = pnand %p1188_p12, %p1447_p4  ;;  %s1476_s29 = int_to_ptr.vmem [resolvable:$true] %s116_s29 }
  0x16   : > { %s1485_s2 = scalar_lea.sflag [#allocation3], %s103_s22  ;;  %s1259_s3 = scalar_lea.hbm %s1474_s27, 256 }
  0x17   : > { %p1260_p1 = scmp.ne.s32.totalorder %s1474_s27, %s1259_s3  ;;  %p1261_p2 = pneg %p1480_p13 }
  0x18   : > { %s1264_s12 = scalar_lea.hbm %s1796_s0, 2048  ;;  %p1265_p4 = scmp.lt.u32.totalorder %s1474_s27, %s1796_s0 }
  0x19   : > { %p1262_p3 = pnand %p1261_p2, %p1260_p1  ;;  %p1266_p6 = scmp.lt.u32.totalorder %s1264_s12, %s1259_s3 }
  0x1a   : > { %p1268_p10 = scmp.lt.u32.totalorder %s1259_s3, %s1474_s27 }
  0x1b   : > { %p1263_p5 = pneg %p1262_p3  ;;  %p1267_p7 = por %p1266_p6, %p1265_p4 }
  0x1d   : > { %p1269_p12 = por %p1268_p10, %p1267_p7 }
  0x1f   : > { %p1270_p0 = pnand %p1269_p12, %p1263_p5 }
  0x21   : > { %1273 = shalt.err (!%p1270_p0)
}
  0x22   : > { %s1274_s16 = scalar_lea.vmem %s1476_s29, 256  ;;  %s1373_s17 = smov [#allocation2]  }
  0x23   : > { %p1275_p1 = scmp.ne.s32.totalorder %s1476_s29, %s1274_s16  ;;  %s1279_s22 = sshll.u32 %s1373_s17, 4  ;;  %s1280_s22 = int_to_ptr.vmem [resolvable:$false] %s1279_s22 }
  0x24   : > { %s1281_s23 = scalar_lea.vmem %s1280_s22, 512  ;;  %p1282_p9 = scmp.lt.s32.totalorder %s1476_s29, %s1280_s22 }
  0x25   : > { %p1277_p3 = pnand %p1275_p1, %p1261_p2  ;;  %p1283_p4 = scmp.lt.s32.totalorder %s1281_s23, %s1274_s16 }
  0x27   : > { %p1278_p11 = pneg %p1277_p3  ;;  %p1284_p6 = por %p1283_p4, %p1282_p9 }
  0x29   : > { %p1285_p7 = pnand %p1284_p6, %p1278_p11 }
  0x2b   : > { %1288 = shalt.err (!%p1285_p7)
}
  0x2c   : > { %s1374_s24 = smov 128   ;;  %s1375_s25 = smov 8  }
  0x2d   : > { %1183 = dma.hbm_to_vmem [thread:$0]  (!%p1480_p13), %s1474_s27, 256, %s1476_s29, %s1485_s2, %s1374_s24, %s1374_s24, %s1375_s25  }
  0x2e   : > { %p124_p0 = scmp.lt.s32.totalorder %s1371_s11, 9  ;;  %p1804_p2 = scmp.ge.s32.totalorder %s1371_s11, 1 }
  0x30   : > { %p125_p5 = pnand %p1804_p2, %p124_p0 }
  0x31   : > { %s1517_s26 = sand.u32 (!%p125_p5), 1, %s1355_s7  }
  0x32   : > { %128 = sbr.rel (%p125_p5) target bundleno = 525 (0x20d), region = 24  ;;  %s1167_s28 = sshll.u32 (!%p125_p5), %s1517_s26, 4 }
  0x33   : > { %s131_s3 = scalar_lea.sflag (!%p125_p5), [#allocation3], %s1517_s26  ;;  %s134_s4 = scalar_lea.vmem (!%p125_p5), [#allocation2], %s1167_s28 }
  0x39   : > { %1342 = dma.done.wait (%p1453_p8), %s131_s3, 256  }
  0x3a   : > { %1344 = vsyncadd (%p1453_p8), %s131_s3, 4294967040  ;;  %v157_v0 = vlaneseq  ;;  %v155_v6 = vld [vmem:[%s134_s4] sm:$0xff]  ;;  %v156_v19 = vld [vmem:[%s134_s4 + $0x8] sm:$0xff]  ;;  %v1376_v30 = vmov 1983009808   ;;  %s1378_s18 = smov 2  }
  0x3b   : > { %v336_v31 = vunpack.c.l.s4 %v1376_v30  ;;  %v1377_v35 = vmov 1934713408   ;;  %s1379_s27 = smov 4   ;;  %s1380_s29 = smov 6   ;;  %vm997_vm0 = vcmask 15360   ;;  %vm1000_vm1 = vcmask 31744  }
  0x3c   : > { %v1527_v1 = vshrl.u32 %v157_v0, 7  ;;  %v400_v36 = vunpack.c.l.s4 %v1377_v35  ;;  %s1381_s30 = smov 8   ;;  %s1382_s2 = smov 10   ;;  %vm1003_vm2 = vcmask 48128   ;;  %vm1006_vm3 = vcmask 64512  }
  0x3d   : > { %v337_v34 = vunpack.c.0.s8 %v336_v31  ;;  %s1383_s5 = smov 12   ;;  %s1384_s12 = smov 14   ;;  %vm1009_vm4 = vcmask 80896   ;;  %vm1012_vm5 = vcmask 97280   ;;  %vm1015_vm6 = vcmask 113664  }
  0x3e   : > { %v181_v2 = vsub.s32 2, %v1527_v1  ;;  %v159_v3 = vsub.s32 0, %v1527_v1  ;;  %v192_v4 = vsub.s32 3, %v1527_v1  ;;  %v170_v5 = vsub.s32 1, %v1527_v1  ;;  %s1385_s13 = smov 16   ;;  %s1386_s15 = smov 18  }
  0x3f   : > { %v214_v11 = vsub.s32 5, %v1527_v1  ;;  %v203_v12 = vsub.s32 4, %v1527_v1  ;;  %v236_v15 = vsub.s32 7, %v1527_v1  ;;  %v225_v16 = vsub.s32 6, %v1527_v1  ;;  %s1387_s16 = smov 20   ;;  %s1388_s17 = smov 22  }
  0x40   : > { %v182_v7 = vrot.slane %v155_v6, %v181_v2  ;;  %v160_v8 = vrot.slane %v155_v6, %v159_v3  ;;  %v193_v9 = vrot.slane %v155_v6, %v192_v4  ;;  %v171_v10 = vrot.slane %v155_v6, %v170_v5  ;;  %s1389_s22 = smov 24   ;;  %s1390_s23 = smov 26  }
  0x41   : > { %v215_v13 = vrot.slane %v155_v6, %v214_v11  ;;  %v204_v14 = vrot.slane %v155_v6, %v203_v12  ;;  %v237_v17 = vrot.slane %v155_v6, %v236_v15  ;;  %v226_v18 = vrot.slane %v155_v6, %v225_v16  ;;  %s1391_s24 = smov 28   ;;  %s1392_s25 = smov 30  }
  0x42   : > { %184 = vbcast.lane.b32.xlu1 %v182_v7, 256  ;;  %162 = vbcast.lane.b32.xlu0 %v160_v8, 256  ;;  %v259_v20 = vrot.slane %v156_v19, %v170_v5  ;;  %v248_v21 = vrot.slane %v156_v19, %v159_v3  ;;  %v281_v22 = vrot.slane %v156_v19, %v192_v4  ;;  %v401_v42 = vunpack.c.0.s8 %v400_v36  ;;  %s1393_s3 = smov 32   ;;  %s152_s4 = scalar_lea.vmem [#allocation5], %s1167_s28 }
  0x43   : > { %v270_v23 = vrot.slane %v156_v19, %v181_v2  ;;  %v303_v24 = vrot.slane %v156_v19, %v214_v11  ;;  %v292_v25 = vrot.slane %v156_v19, %v203_v12  ;;  %v325_v26 = vrot.slane %v156_v19, %v236_v15  ;;  %s1175_s28 = sshll.u32 %s1363_s9, 8  ;;  %p1805_p9 = scmp.ne.s32.totalorder %s1801_s19, 0 }
  0x44   : > { %v314_v27 = vrot.slane %v156_v19, %v225_v16  ;;  %v1538_v40 = vsub.s32 %v337_v34, %v1527_v1  ;;  %v1545_v51 = vsub.s32 %v401_v42, %v1527_v1  ;;  %vm1018_vm7 = vcmask 130048   ;;  %s1394_s9 = smov [#allocation5]  }
  0x45   : > { %vm1021_vm8 = vcmask 146432   ;;  %vm1024_vm9 = vcmask 162816   ;;  %vm1027_vm10 = vcmask 179200   ;;  %vm1030_vm11 = vcmask 195584  }
  0x46   : > { %195 = vbcast.lane.b32.xlu1 %v193_v9, 256  ;;  %173 = vbcast.lane.b32.xlu0 %v171_v10, 256  ;;  %vm1033_vm12 = vcmask 211968   ;;  %vm1036_vm13 = vcmask 228352   ;;  %vm1039_vm14 = vcmask 244736   ;;  %vm1042_vm15 = vcmask 261120  }
  0x4a   : > { %217 = vbcast.lane.b32.xlu1 %v215_v13, 256  ;;  %206 = vbcast.lane.b32.xlu0 %v204_v14, 256 }
  0x4e   : > { %239 = vbcast.lane.b32.xlu1 %v237_v17, 256  ;;  %228 = vbcast.lane.b32.xlu0 %v226_v18, 256 }
  0x52   : > { %261 = vbcast.lane.b32.xlu1 %v259_v20, 256  ;;  %250 = vbcast.lane.b32.xlu0 %v248_v21, 256 }
  0x56   : > { %283 = vbcast.lane.b32.xlu1 %v281_v22, 256  ;;  %272 = vbcast.lane.b32.xlu0 %v270_v23, 256 }
  0x5a   : > { %305 = vbcast.lane.b32.xlu1 %v303_v24, 256  ;;  %294 = vbcast.lane.b32.xlu0 %v292_v25, 256 }
  0x5e   : > { %327 = vbcast.lane.b32.xlu1 %v325_v26, 256  ;;  %316 = vbcast.lane.b32.xlu0 %v314_v27, 256 }
  0x62   : > { %177 = vbcast.lane.b32.xlu1 %v171_v10, 264  ;;  %166 = vbcast.lane.b32.xlu0 %v160_v8, 264 }
  0x66   : > { %199 = vbcast.lane.b32.xlu1 %v193_v9, 264  ;;  %188 = vbcast.lane.b32.xlu0 %v182_v7, 264 }
  0x6a   : > { %221 = vbcast.lane.b32.xlu1 %v215_v13, 264  ;;  %210 = vbcast.lane.b32.xlu0 %v204_v14, 264 }
  0x6e   : > { %243 = vbcast.lane.b32.xlu1 %v237_v17, 264  ;;  %232 = vbcast.lane.b32.xlu0 %v226_v18, 264 }
  0x72   : > { %265 = vbcast.lane.b32.xlu1 %v259_v20, 264  ;;  %254 = vbcast.lane.b32.xlu0 %v248_v21, 264 }
  0x76   : > { %287 = vbcast.lane.b32.xlu1 %v281_v22, 264  ;;  %276 = vbcast.lane.b32.xlu0 %v270_v23, 264 }
  0x7a   : > { %309 = vbcast.lane.b32.xlu1 %v303_v24, 264  ;;  %298 = vbcast.lane.b32.xlu0 %v292_v25, 264 }
  0x7e   : > { %331 = vbcast.lane.b32.xlu1 %v325_v26, 264  ;;  %320 = vbcast.lane.b32.xlu0 %v314_v27, 264 }
  0xb4   : > { %v185_v28 = vpop.permute.xlu1 %184  ;;  %v163_v29 = vpop.permute.xlu0 %162 }
  0xb5   : > { %v333_v41 = vcombine.low %v163_v29, %v185_v28  ;;  %v334_v1 = vcombine.high %v163_v29, %v185_v28 }
  0xb7   : > { %v341_v48 = vrot.slane %v333_v41, %v1538_v40  ;;  %v348_v13 = vrot.slane %v334_v1, %v1538_v40 }
  0xb8   : > { %v196_v32 = vpop.permute.xlu1 %195  ;;  %v174_v33 = vpop.permute.xlu0 %173 }
  0xb9   : > { %v349_v37 = vcombine.low %v174_v33, %v196_v32  ;;  %v350_v59 = vcombine.high %v174_v33, %v196_v32 }
  0xbb   : > { %v357_v43 = vrot.slane %v349_v37, %v1538_v40  ;;  %v364_v6 = vrot.slane %v350_v59, %v1538_v40 }
  0xbc   : > { %v218_v38 = vpop.permute.xlu1 %217  ;;  %v207_v39 = vpop.permute.xlu0 %206 }
  0xbd   : > { %v397_v52 = vcombine.low %v341_v48, %v357_v43  ;;  %v398_v61 = vcombine.high %v341_v48, %v357_v43  ;;  %v413_v16 = vcombine.low %v348_v13, %v364_v6  ;;  %v414_v37 = vcombine.high %v348_v13, %v364_v6 }
  0xbf   : > { %v1555_v0 = vrot.slane %v397_v52, %v1545_v51  ;;  %v412_v11 = vrot.slane %v398_v61, %v1545_v51  ;;  %v421_v30 = vrot.slane %v413_v16, %v1545_v51 }
  0xc0   : > { %v240_v44 = vpop.permute.xlu1 %239  ;;  %v229_v45 = vpop.permute.xlu0 %228 }
  0xc1   : > { %v381_v46 = vcombine.low %v218_v38, %v240_v44  ;;  %v365_v47 = vcombine.low %v207_v39, %v229_v45  ;;  %v382_v56 = vcombine.high %v218_v38, %v240_v44  ;;  %v366_v57 = vcombine.high %v207_v39, %v229_v45 }
  0xc3   : > { %v389_v49 = vrot.slane %v381_v46, %v1538_v40  ;;  %v373_v50 = vrot.slane %v365_v47, %v1538_v40  ;;  %v396_v2 = vrot.slane %v382_v56, %v1538_v40  ;;  %v380_v3 = vrot.slane %v366_v57, %v1538_v40 }
  0xc4   : > { %v1547_v53 = vpop.permute.xlu1 %261  ;;  %v1549_v54 = vpop.permute.xlu0 %250 }
  0xc5   : > { %v429_v55 = vcombine.low %v373_v50, %v389_v49  ;;  %v430_v58 = vcombine.high %v373_v50, %v389_v49  ;;  %v445_v14 = vcombine.low %v380_v3, %v396_v2  ;;  %v446_v31 = vcombine.high %v380_v3, %v396_v2 }
  0xc7   : > { %v1552_v60 = vrot.slane %v429_v55, %v1545_v51  ;;  %v444_v5 = vrot.slane %v430_v58, %v1545_v51  ;;  %v453_v24 = vrot.slane %v445_v14, %v1545_v51  ;;  %v460_v47 = vrot.slane %v446_v31, %v1545_v51 }
  0xc8   : > { %v284_v62 = vpop.permute.xlu1 %283  ;;  %v273_v63 = vpop.permute.xlu0 %272  ;;  %v428_v55 = vrot.slane %v414_v37, %v1545_v51 }
  0xc9   : > { %v462_v4 = vcombine.high %v1555_v0, %v1552_v60  ;;  %v485_v7 = vcombine.low %v1547_v53, %v284_v62  ;;  %v469_v8 = vcombine.low %v1549_v54, %v273_v63  ;;  %v461_v12 = vcombine.low %v1555_v0, %v1552_v60 }
  0xca   : > { %v463_v15 = vcombine.low %v412_v11, %v444_v5  ;;  %v464_v23 = vcombine.high %v412_v11, %v444_v5  ;;  %v465_v36 = vcombine.low %v421_v30, %v453_v24  ;;  %v486_v38 = vcombine.high %v1547_v53, %v284_v62 }
  0xcb   : > { %879 = vrot.lane.b32.xlu0 %v462_v4, %s1378_s18  ;;  %v493_v17 = vrot.slane %v485_v7, %v1538_v40  ;;  %v477_v18 = vrot.slane %v469_v8, %v1538_v40  ;;  %v470_v39 = vcombine.high %v1549_v54, %v273_v63  ;;  %v466_v46 = vcombine.high %v421_v30, %v453_v24 }
  0xcc   : > { %v306_v9 = vpop.permute.xlu1 %305  ;;  %v295_v10 = vpop.permute.xlu0 %294  ;;  %v500_v53 = vrot.slane %v486_v38, %v1538_v40  ;;  %v467_v63 = vcombine.low %v428_v55, %v460_v47 }
  0xcd   : > { %v533_v27 = vcombine.low %v477_v18, %v493_v17  ;;  %v534_v42 = vcombine.high %v477_v18, %v493_v17  ;;  %v484_v54 = vrot.slane %v470_v39, %v1538_v40 }
  0xcf   : > { %887 = vrot.lane.b32.xlu0 %v463_v15, %s1379_s27  ;;  %v1593_v45 = vrot.slane %v533_v27, %v1545_v51  ;;  %v548_v61 = vrot.slane %v534_v42, %v1545_v51  ;;  %v549_v3 = vcombine.low %v484_v54, %v500_v53 }
  0xd0   : > { %v328_v19 = vpop.permute.xlu1 %327  ;;  %v317_v20 = vpop.permute.xlu0 %316 }
  0xd1   : > { %v517_v21 = vcombine.low %v306_v9, %v328_v19  ;;  %v501_v22 = vcombine.low %v295_v10, %v317_v20  ;;  %v518_v33 = vcombine.high %v306_v9, %v328_v19  ;;  %v502_v34 = vcombine.high %v295_v10, %v317_v20 }
  0xd2   : > { %v468_v10 = vcombine.high %v428_v55, %v460_v47  ;;  %v557_v20 = vrot.slane %v549_v3, %v1545_v51 }
  0xd3   : > { %v525_v25 = vrot.slane %v517_v21, %v1538_v40  ;;  %v509_v26 = vrot.slane %v501_v22, %v1538_v40  ;;  %895 = vrot.lane.b32.xlu0 %v464_v23, %s1380_s29  ;;  %v532_v48 = vrot.slane %v518_v33, %v1538_v40  ;;  %v516_v49 = vrot.slane %v502_v34, %v1538_v40 }
  0xd4   : > { %v1577_v28 = vpop.permute.xlu1 %177  ;;  %v1579_v29 = vpop.permute.xlu0 %166  ;;  %v550_v23 = vcombine.high %v484_v54, %v500_v53 }
  0xd5   : > { %v565_v32 = vcombine.low %v509_v26, %v525_v25  ;;  %v566_v35 = vcombine.high %v509_v26, %v525_v25  ;;  %v581_v62 = vcombine.low %v516_v49, %v532_v48  ;;  %v582_v16 = vcombine.high %v516_v49, %v532_v48 }
  0xd6   : > { %v564_v48 = vrot.slane %v550_v23, %v1545_v51 }
  0xd7   : > { %v1585_v41 = vrot.slane %v565_v32, %v1545_v51  ;;  %903 = vrot.lane.b32.xlu0 %v465_v36, %s1381_s30  ;;  %v580_v52 = vrot.slane %v566_v35, %v1545_v51  ;;  %v589_v13 = vrot.slane %v581_v62, %v1545_v51  ;;  %v596_v33 = vrot.slane %v582_v16, %v1545_v51 }
  0xd8   : > { %v1588_v43 = vpop.permute.xlu1 %199  ;;  %v1590_v44 = vpop.permute.xlu0 %188 }
  0xd9   : > { %v598_v50 = vcombine.high %v1593_v45, %v1585_v41  ;;  %v621_v56 = vcombine.low %v1577_v28, %v1588_v43  ;;  %v605_v57 = vcombine.low %v1579_v29, %v1590_v44  ;;  %v599_v1 = vcombine.low %v548_v61, %v580_v52 }
  0xda   : > { %v597_v2 = vcombine.low %v1593_v45, %v1585_v41  ;;  %v600_v11 = vcombine.high %v548_v61, %v580_v52  ;;  %v601_v22 = vcombine.low %v557_v20, %v589_v13  ;;  %v622_v24 = vcombine.high %v1577_v28, %v1588_v43 }
  0xdb   : > { %911 = vrot.lane.b32.xlu0 %v466_v46, %s1382_s2  ;;  %881 = vrot.lane.b32.xlu1 %v598_v50, %s1378_s18  ;;  %v1614_v4 = vrot.slane %v621_v56, %v1538_v40  ;;  %v1617_v5 = vrot.slane %v605_v57, %v1538_v40  ;;  %v606_v34 = vcombine.high %v1579_v29, %v1590_v44  ;;  %s1072_s18 = sshll.u32 %s152_s4, 4  ;;  %s1747_s18 = int_to_ptr.vmem [resolvable:$true] %s1072_s18 }
  0xdc   : > { %v222_v58 = vpop.permute.xlu1 %221  ;;  %v211_v59 = vpop.permute.xlu0 %210  ;;  %v602_v37 = vcombine.high %v557_v20, %v589_v13  ;;  %v1638_v43 = vrot.slane %v622_v24, %v1538_v40  ;;  %v603_v56 = vcombine.low %v564_v48, %v596_v33  ;;  %v604_v13 = vcombine.high %v564_v48, %v596_v33 }
  0xdd   : > { %v669_v17 = vcombine.low %v1617_v5, %v1614_v4  ;;  %v670_v49 = vcombine.high %v1617_v5, %v1614_v4  ;;  %v1654_v53 = vrot.slane %v606_v34, %v1538_v40 }
  0xdf   : > { %919 = vrot.lane.b32.xlu0 %v467_v63, %s1383_s5  ;;  %889 = vrot.lane.b32.xlu1 %v599_v1, %s1379_s27  ;;  %v677_v32 = vrot.slane %v669_v17, %v1545_v51  ;;  %v684_v5 = vrot.slane %v670_v49, %v1545_v51 }
  0xe0   : > { %v244_v6 = vpop.permute.xlu1 %243  ;;  %v233_v7 = vpop.permute.xlu0 %232 }
  0xe1   : > { %v653_v8 = vcombine.low %v222_v58, %v244_v6  ;;  %v637_v9 = vcombine.low %v211_v59, %v233_v7  ;;  %v654_v26 = vcombine.high %v222_v58, %v244_v6  ;;  %v638_v27 = vcombine.high %v211_v59, %v233_v7 }
  0xe3   : > { %v661_v14 = vrot.slane %v653_v8, %v1538_v40  ;;  %v645_v15 = vrot.slane %v637_v9, %v1538_v40  ;;  %927 = vrot.lane.b32.xlu0 %v468_v10, %s1384_s12  ;;  %897 = vrot.lane.b32.xlu1 %v600_v11, %s1380_s29  ;;  %v1646_v29 = vrot.slane %v654_v26, %v1538_v40 }
  0xe4   : > { %v266_v18 = vpop.permute.xlu1 %265  ;;  %v255_v19 = vpop.permute.xlu0 %254  ;;  %v1649_v44 = vrot.slane %v638_v27, %v1538_v40  ;;  %v685_v10 = vcombine.low %v1654_v53, %v1638_v43 }
  0xe5   : > { %v701_v21 = vcombine.low %v645_v15, %v661_v14  ;;  %v702_v38 = vcombine.high %v645_v15, %v661_v14 }
  0xe6   : > { %v717_v1 = vcombine.low %v1649_v44, %v1646_v29  ;;  %v693_v24 = vrot.slane %v685_v10, %v1545_v51 }
  0xe7   : > { %v709_v25 = vrot.slane %v701_v21, %v1545_v51  ;;  %905 = vrot.lane.b32.xlu1 %v601_v22, %s1381_s30  ;;  %v716_v61 = vrot.slane %v702_v38, %v1545_v51 }
  0xe8   : > { %v288_v30 = vpop.permute.xlu1 %287  ;;  %v277_v31 = vpop.permute.xlu0 %276  ;;  %v725_v22 = vrot.slane %v717_v1, %v1545_v51 }
  0xe9   : > { %v758_v35 = vcombine.high %v266_v18, %v288_v30  ;;  %v742_v36 = vcombine.high %v255_v19, %v277_v31  ;;  %v757_v28 = vcombine.low %v266_v18, %v288_v30  ;;  %v741_v39 = vcombine.low %v255_v19, %v277_v31 }
  0xea   : > { %v733_v42 = vcombine.low %v677_v32, %v709_v25  ;;  %v734_v59 = vcombine.high %v677_v32, %v709_v25  ;;  %v735_v14 = vcombine.low %v684_v5, %v716_v61  ;;  %v736_v23 = vcombine.high %v684_v5, %v716_v61 }
  0xeb   : > { %v772_v46 = vrot.slane %v758_v35, %v1538_v40  ;;  %v756_v47 = vrot.slane %v742_v36, %v1538_v40  ;;  %913 = vrot.lane.b32.xlu1 %v602_v37, %s1382_s2  ;;  %v765_v57 = vrot.slane %v757_v28, %v1538_v40  ;;  %v749_v58 = vrot.slane %v741_v39, %v1538_v40  ;;  %s1745_s2 = scalar_lea.hbm %s1797_s1, %s1175_s28 }
  0xec   : > { %935 = vrot.lane.b32.xlu0 %v733_v42, %s1385_s13  ;;  %v310_v50 = vpop.permute.xlu1 %309  ;;  %v299_v52 = vpop.permute.xlu0 %298  ;;  %v718_v30 = vcombine.high %v1649_v44, %v1646_v29  ;;  %v737_v32 = vcombine.low %v693_v24, %v725_v22  ;;  %v686_v28 = vcombine.high %v1654_v53, %v1638_v43 }
  0xed   : > { %v821_v54 = vcombine.low %v756_v47, %v772_v46  ;;  %v822_v55 = vcombine.high %v756_v47, %v772_v46  ;;  %v805_v11 = vcombine.low %v749_v58, %v765_v57  ;;  %v806_v38 = vcombine.high %v749_v58, %v765_v57 }
  0xee   : > { %v738_v46 = vcombine.high %v693_v24, %v725_v22  ;;  %v732_v47 = vrot.slane %v718_v30, %v1545_v51  ;;  %v700_v49 = vrot.slane %v686_v28, %v1545_v51 }
  0xef   : > { %v1660_v62 = vrot.slane %v821_v54, %v1545_v51  ;;  %v1663_v63 = vrot.slane %v822_v55, %v1545_v51  ;;  %921 = vrot.lane.b32.xlu1 %v603_v56, %s1383_s5  ;;  %v813_v25 = vrot.slane %v805_v11, %v1545_v51  ;;  %v820_v48 = vrot.slane %v806_v38, %v1545_v51  ;;  %s1057_s5 = scalar_lea.sflag [#allocation4], %s1517_s26 }
  0xf0   : > { %943 = vrot.lane.b32.xlu0 %v734_v59, %s1386_s15  ;;  %v332_v3 = vpop.permute.xlu1 %331  ;;  %v321_v4 = vpop.permute.xlu0 %320  ;;  %v739_v44 = vcombine.low %v700_v49, %v732_v47 }
  0xf1   : > { %v789_v6 = vcombine.low %v310_v50, %v332_v3  ;;  %v790_v7 = vcombine.high %v310_v50, %v332_v3  ;;  %v773_v8 = vcombine.low %v299_v52, %v321_v4  ;;  %v774_v9 = vcombine.high %v299_v52, %v321_v4 }
  0xf2   : > { %v740_v50 = vcombine.high %v700_v49, %v732_v47 }
  0xf3   : > { %v797_v15 = vrot.slane %v789_v6, %v1538_v40  ;;  %v804_v16 = vrot.slane %v790_v7, %v1538_v40  ;;  %v781_v17 = vrot.slane %v773_v8, %v1538_v40  ;;  %v788_v18 = vrot.slane %v774_v9, %v1538_v40  ;;  %929 = vrot.lane.b32.xlu1 %v604_v13, %s1384_s12  ;;  %s1289_s12 = scalar_lea.vmem %s1747_s18, 256 }
  0xf4   : > { %951 = vrot.lane.b32.xlu0 %v735_v14, %s1387_s16  ;;  %p1290_p8 = scmp.ne.s32.totalorder %s1747_s18, %s1289_s12 }
  0xf5   : > { %v837_v19 = vcombine.low %v781_v17, %v797_v15  ;;  %v853_v20 = vcombine.low %v788_v18, %v804_v16  ;;  %v854_v21 = vcombine.high %v788_v18, %v804_v16  ;;  %v838_v31 = vcombine.high %v781_v17, %v797_v15 }
  0xf6   : > { %p1291_p11 = pnand %p1290_p8, %p1805_p9 }
  0xf7   : > { %v845_v26 = vrot.slane %v837_v19, %v1545_v51  ;;  %v861_v27 = vrot.slane %v853_v20, %v1545_v51  ;;  %v868_v40 = vrot.slane %v854_v21, %v1545_v51  ;;  %v852_v42 = vrot.slane %v838_v31, %v1545_v51 }
  0xf8   : > { %959 = vrot.lane.b32.xlu0 %v736_v23, %s1388_s17  ;;  %p1292_p13 = pneg %p1291_p11 }
  0xf9   : > { %v869_v33 = vcombine.low %v813_v25, %v845_v26  ;;  %v873_v34 = vcombine.low %v1660_v62, %v861_v27  ;;  %v874_v35 = vcombine.high %v1660_v62, %v861_v27  ;;  %v875_v36 = vcombine.low %v1663_v63, %v868_v40 }
  0xfa   : > { %v876_v37 = vcombine.high %v1663_v63, %v868_v40  ;;  %v870_v39 = vcombine.high %v813_v25, %v845_v26  ;;  %v871_v29 = vcombine.low %v820_v48, %v852_v42  ;;  %v872_v43 = vcombine.high %v820_v48, %v852_v42 }
  0xfb   : > { %937 = vrot.lane.b32.xlu1 %v869_v33, %s1385_s13  ;;  %s1293_s13 = sshll.u32 %s1394_s9, 4  ;;  %s1294_s13 = int_to_ptr.vmem [resolvable:$false] %s1293_s13 }
  0xfc   : > { %967 = vrot.lane.b32.xlu0 %v737_v32, %s1389_s22  ;;  %p1296_p10 = scmp.lt.s32.totalorder %s1747_s18, %s1294_s13 }
  0xff   : > { %945 = vrot.lane.b32.xlu1 %v870_v39, %s1386_s15  ;;  %s1295_s15 = scalar_lea.vmem %s1294_s13, 512 }
 0x100   : > { %975 = vrot.lane.b32.xlu0 %v738_v46, %s1390_s23  ;;  %p1297_p12 = scmp.lt.s32.totalorder %s1295_s15, %s1289_s12 }
 0x102   : > { %p1298_p1 = por %p1297_p12, %p1296_p10 }
 0x103   : > { %953 = vrot.lane.b32.xlu1 %v871_v29, %s1387_s16 }
 0x104   : > { %983 = vrot.lane.b32.xlu0 %v739_v44, %s1391_s24  ;;  %p1299_p3 = pnand %p1298_p1, %p1292_p13 }
 0x107   : > { %961 = vrot.lane.b32.xlu1 %v872_v43, %s1388_s17 }
 0x108   : > { %991 = vrot.lane.b32.xlu0 %v740_v50, %s1392_s25 }
 0x10b   : > { %969 = vrot.lane.b32.xlu1 %v873_v34, %s1389_s22 }
 0x10f   : > { %977 = vrot.lane.b32.xlu1 %v874_v35, %s1390_s23 }
 0x113   : > { %985 = vrot.lane.b32.xlu1 %v875_v36, %s1391_s24 }
 0x117   : > { %993 = vrot.lane.b32.xlu1 %v876_v37, %s1392_s25 }
 0x13d   : > { %v880_v52 = vpop.permute.xlu0 %879 }
 0x13e   : > { %v998_v8 = vsel %vm997_vm0, %v461_v12, %v880_v52 }
 0x141   : > { %v888_v53 = vpop.permute.xlu0 %887 }
 0x142   : > { %v1001_v10 = vsel %vm1000_vm1, %v998_v8, %v888_v53 }
 0x145   : > { %v896_v54 = vpop.permute.xlu0 %895 }
 0x146   : > { %v1004_v13 = vsel %vm1003_vm2, %v1001_v10, %v896_v54 }
 0x149   : > { %v904_v51 = vpop.permute.xlu0 %903 }
 0x14a   : > { %v1007_v14 = vsel %vm1006_vm3, %v1004_v13, %v904_v51 }
 0x14d   : > { %v882_v55 = vpop.permute.xlu1 %881  ;;  %v912_v56 = vpop.permute.xlu0 %911 }
 0x14e   : > { %v1010_v15 = vsel %vm1009_vm4, %v1007_v14, %v912_v56  ;;  %v999_v30 = vsel %vm997_vm0, %v597_v2, %v882_v55  ;;  %vm1053_vm0 = vcmask 523520  }
 0x151   : > { %v890_v57 = vpop.permute.xlu1 %889  ;;  %v920_v58 = vpop.permute.xlu0 %919 }
 0x152   : > { %v1013_v60 = vsel %vm1012_vm5, %v1010_v15, %v920_v58  ;;  %v1002_v31 = vsel %vm1000_vm1, %v999_v30, %v890_v57 }
 0x155   : > { %v898_v59 = vpop.permute.xlu1 %897  ;;  %v928_v61 = vpop.permute.xlu0 %927 }
 0x156   : > { %v1016_v12 = vsel %vm1015_vm6, %v1013_v60, %v928_v61  ;;  %v1005_v33 = vsel %vm1003_vm2, %v1002_v31, %v898_v59 }
 0x159   : > { %v906_v62 = vpop.permute.xlu1 %905 }
 0x15a   : > { %v1008_v34 = vsel %vm1006_vm3, %v1005_v33, %v906_v62 }
 0x15d   : > { %v914_v63 = vpop.permute.xlu1 %913 }
 0x15e   : > { %v936_v1 = vpop.permute.xlu0 %935  ;;  %v1011_v35 = vsel %vm1009_vm4, %v1008_v34, %v914_v63 }
 0x15f   : > { %v1019_v17 = vsel %vm1018_vm7, %v1016_v12, %v936_v1 }
 0x161   : > { %v922_v4 = vpop.permute.xlu1 %921 }
 0x162   : > { %v944_v3 = vpop.permute.xlu0 %943  ;;  %v1014_v36 = vsel %vm1012_vm5, %v1011_v35, %v922_v4 }
 0x163   : > { %v1022_v18 = vsel %vm1021_vm8, %v1019_v17, %v944_v3 }
 0x165   : > { %v930_v6 = vpop.permute.xlu1 %929 }
 0x166   : > { %v952_v5 = vpop.permute.xlu0 %951  ;;  %v1017_v45 = vsel %vm1015_vm6, %v1014_v36, %v930_v6 }
 0x167   : > { %v1025_v20 = vsel %vm1024_vm9, %v1022_v18, %v952_v5 }
 0x16a   : > { %v960_v7 = vpop.permute.xlu0 %959 }
 0x16b   : > { %v1028_v22 = vsel %vm1027_vm10, %v1025_v20, %v960_v7 }
 0x16d   : > { %v938_v9 = vpop.permute.xlu1 %937 }
 0x16e   : > { %v968_v11 = vpop.permute.xlu0 %967  ;;  %v1020_v2 = vsel %vm1018_vm7, %v1017_v45, %v938_v9 }
 0x16f   : > { %v1031_v23 = vsel %vm1030_vm11, %v1028_v22, %v968_v11 }
 0x171   : > { %v946_v16 = vpop.permute.xlu1 %945 }
 0x172   : > { %v976_v0 = vpop.permute.xlu0 %975  ;;  %v1023_v37 = vsel %vm1021_vm8, %v1020_v2, %v946_v16 }
 0x173   : > { %v1034_v24 = vsel %vm1033_vm12, %v1031_v23, %v976_v0 }
 0x175   : > { %v954_v19 = vpop.permute.xlu1 %953 }
 0x176   : > { %v984_v21 = vpop.permute.xlu0 %983  ;;  %v1026_v38 = vsel %vm1024_vm9, %v1023_v37, %v954_v19 }
 0x177   : > { %v1037_v26 = vsel %vm1036_vm13, %v1034_v24, %v984_v21 }
 0x179   : > { %v962_v25 = vpop.permute.xlu1 %961 }
 0x17a   : > { %v992_v27 = vpop.permute.xlu0 %991  ;;  %v1029_v39 = vsel %vm1027_vm10, %v1026_v38, %v962_v25 }
 0x17b   : > { %v1040_v40 = vsel %vm1039_vm14, %v1037_v26, %v992_v27 }
 0x17c   : > { %1047 = vrot.lane.b32.xlu0 %v1040_v40, %s1393_s3  ;;  %1043 = vst.msk [vmem:[%s152_s4] sm:$0xff] %vm1042_vm15, %v1040_v40 }
 0x17d   : > { %v970_v32 = vpop.permute.xlu1 %969 }
 0x17e   : > { %v1032_v42 = vsel %vm1030_vm11, %v1029_v39, %v970_v32 }
 0x181   : > { %v978_v41 = vpop.permute.xlu1 %977 }
 0x182   : > { %v1035_v46 = vsel %vm1033_vm12, %v1032_v42, %v978_v41 }
 0x185   : > { %v986_v28 = vpop.permute.xlu1 %985 }
 0x186   : > { %v1038_v47 = vsel %vm1036_vm13, %v1035_v46, %v986_v28 }
 0x189   : > { %v994_v48 = vpop.permute.xlu1 %993 }
 0x18a   : > { %v1041_v49 = vsel %vm1039_vm14, %v1038_v47, %v994_v48 }
 0x18b   : > { %1049 = vrot.lane.b32.xlu1 %v1041_v49, %s1393_s3  ;;  %1044 = vst.msk [vmem:[%s152_s4 + $0x8] sm:$0xff] %vm1042_vm15, %v1041_v49 }
 0x1ee   : > { %v1048_v29 = vpop.permute.xlu0 %1047 }
 0x1ef   : > { %1054 = vst.msk [vmem:[%s152_s4] sm:$0xff] %vm1053_vm0, %v1048_v29 }
 0x1fd   : > { %v1050_v44 = vpop.permute.xlu1 %1049 }
 0x1fe   : > { %1055 = vst.msk [vmem:[%s152_s4 + $0x8] sm:$0xff] %vm1053_vm0, %v1050_v44 }
 0x1ff   : > { %1302 = shalt.err (!%p1299_p3)
}
 0x200   : > { %s1303_s16 = scalar_lea.hbm %s1745_s2, 256  ;;  %s1307_s23 = scalar_lea.hbm %s1797_s1, 2048 }
 0x201   : > { %p1304_p4 = scmp.ne.s32.totalorder %s1745_s2, %s1303_s16  ;;  %p1308_p0 = scmp.lt.u32.totalorder %s1745_s2, %s1797_s1 }
 0x202   : > { %p1309_p2 = scmp.lt.u32.totalorder %s1307_s23, %s1303_s16  ;;  %p1311_p8 = scmp.lt.u32.totalorder %s1303_s16, %s1745_s2 }
 0x203   : > { %p1305_p6 = pnand %p1304_p4, %p1805_p9 }
 0x204   : > { %p1310_p5 = por %p1309_p2, %p1308_p0 }
 0x205   : > { %p1306_p7 = pneg %p1305_p6 }
 0x206   : > { %p1312_p11 = por %p1311_p8, %p1310_p5 }
 0x208   : > { %p1313_p13 = pnand %p1312_p11, %p1306_p7 }
 0x20a   : > { %1316 = shalt.err (!%p1313_p13)
}
 0x20b   : > { %s1395_s3 = smov 128  }
 0x20c   : > { %1178 = dma.vmem_to_hbm [thread:$0]  (%p1805_p9), %s1747_s18, 256, %s1745_s2, %s1057_s5, %s1395_s3, %s1395_s3, %s1381_s30  }
 0x20d PF: > { %p1189_p10 = scmp.ge.s32.totalorder %s1371_s11, 2  ;;  %s1087_s4 = sand.u32 1, %s1351_s6  }
 0x20e   : > { %p1806_p12 = scmp.ne.s32.totalorder %s1802_s21, 0  ;;  %s1088_s28 = scalar_lea.sflag [#allocation4], %s1087_s4 }
 0x210   : > { %p1185_p1 = pnand %p1189_p10, %p1806_p12 }
 0x212   : > { %1346 = dma.done.wait (!%p1185_p1), %s1088_s28, 256  }
 0x213   : > { %1348 = vsyncadd (!%p1185_p1), %s1088_s28, 4294967040  ;;  %s17_s11 = sadd.s32 1, %s1371_s11   ;;  %s1807_s6 = smov %s1355_s7 }
 0x214   : > { %p14_p3 = scmp.ge.s32.totalorder %s17_s11, 10   ;;  %s1808_s7 = smov %s1359_s8 }
 0x215   : > { %s1809_s8 = smov %s1462_s20  ;;  %s1810_s9 = smov %s1367_s10 }
 0x216   : > { %s1811_s10 = smov %s1813_s14  ;;  %16 = sbr.rel (!%p14_p3) target bundleno = 6 (0x6), region = 69 }
 0x21d   :  { %1093 = vsyncpa [#allocation3], 1 }
 0x21e   :  { %1095 = vsyncpa [#allocation3 + $0x1], 1 }
 0x21f   :  { %1096 = vsyncpa [#allocation4], 1 }
 0x220   :  { %1098 = vsyncpa [#allocation4 + $0x1], 1 }

</bundles_post_ra>
